<compile_context>
chip_gen: v7x
topology: tpu7x:2x2x1
jax: 0.10.0
libtpu: 0.0.40
codegen_flags: <defaults>
</compile_context>

<pallas_src>
import functools

import jax
import jax.numpy as jnp
from jax.experimental import pallas as pl
from jax.experimental.pallas import tpu as pltpu


def _ctx_gru_kernel(xp_ref, h0_ref, wh_ref, bh_ref,
                    out_ref, hT_ref,
                    h_sc, *, hidden_size, time_block):
    """One grid step == `time_block` time steps of the GRU recurrence.

    xp_ref : (TB, B, 3H) f32   precomputed x-projection, layout [r | z | tilda],
                               with input biases and ctx@Wc^T + bc already folded
                               into the [r | z] slice.
    h0_ref : (B, H)            initial hidden state.
    wh_ref : (H, 3H) bf16      [Wh_zr^T | Wh_tilda^T]  (MXU operand).
    bh_ref : (1, 3H) f32       [bh_zr | bh_tilda].
    out_ref: (TB, B, H)        per-step hidden outputs for this block.
    hT_ref : (B, H)            final hidden state (written on last grid step only).
    h_sc   : (B, H) f32        hidden-state carry across grid steps.
    """
    t = pl.program_id(0)
    H = hidden_size
    B = h_sc.shape[0]

    @pl.when(t == 0)
    def _():
        h_sc[...] = h0_ref[...].astype(jnp.float32)

    h = h_sc[...]                                   # (B, H) f32, lives in vregs below
    wh = wh_ref[...]                                # (H, 3H) bf16
    # Hoist the bias broadcast out of the unrolled loop (JAX does not CSE broadcasts).
    bh = jnp.broadcast_to(bh_ref[...], (B, 3 * H))  # (B, 3H) f32

    for i in range(time_block):                     # static unroll, small trip count
        xp = xp_ref[i]                              # (B, 3H) f32

        # Only per-step matmul on the sequential critical path: h @ Wh (bf16 -> f32 acc).
        hp = jnp.dot(h.astype(wh.dtype), wh,
                     preferred_element_type=jnp.float32) + bh   # (B, 3H)

        zr = xp[:, 0:2 * H] + hp[:, 0:2 * H]
        r = jax.nn.sigmoid(zr[:, 0:H])
        z = jax.nn.sigmoid(zr[:, H:2 * H])
        h_tilda = jnp.tanh(xp[:, 2 * H:3 * H] + r * hp[:, 2 * H:3 * H])
        h = z * h_tilda + (1.0 - z) * h

        out_ref[i] = h.astype(out_ref.dtype)

    h_sc[...] = h                                   # single carry write per grid step

    @pl.when(t == pl.num_programs(0) - 1)
    def _():
        hT_ref[...] = h.astype(hT_ref.dtype)


def context_gru_forward(x, h0, ctx, params, *, batch_first=True, time_block=8):
    """Pallas implementation of ContextGRU.forward.

    x   : (B, T, I) if batch_first else (T, B, I)
    h0  : (B, H)
    ctx : (B, C)
    params (PyTorch nn.Linear convention, weight shape (out, in)):
        w_i2h_zr (2H, I), b_i2h_zr (2H,)
        w_h2h_zr (2H, H), b_h2h_zr (2H,)
        w_i2h_tilda (H, I), b_i2h_tilda (H,)
        w_h2h_tilda (H, H), b_h2h_tilda (H,)
        w_ctx2h (2H, C),  b_ctx2h (2H,)
    Returns (output, hidden) with output (B, T, H) if batch_first else (T, B, H).
    """
    x_tm = jnp.transpose(x, (1, 0, 2)) if batch_first else x      # (T, B, I)
    T, B, I = x_tm.shape
    H = h0.shape[-1]
    f32 = jnp.float32

    # --- Hoisted, fully-parallel precompute (plain XLA in the wrapper) --------------
    # Combined input projection weight [Wi_zr^T | Wi_tilda^T] : (I, 3H)
    wx = jnp.concatenate([params["w_i2h_zr"].T, params["w_i2h_tilda"].T],
                         axis=1).astype(f32)
    bx = jnp.concatenate([params["b_i2h_zr"], params["b_i2h_tilda"]]).astype(f32)

    xp = jnp.dot(x_tm.reshape(T * B, I).astype(f32), wx,
                 preferred_element_type=f32) + bx                  # (T*B, 3H)
    xp = xp.reshape(T, B, 3 * H)

    # Time-invariant context contribution folded into the [r | z] slice.
    ctx_g = jnp.dot(ctx.astype(f32), params["w_ctx2h"].T.astype(f32),
                    preferred_element_type=f32) + params["b_ctx2h"].astype(f32)  # (B, 2H)
    xp = xp.at[:, :, :2 * H].add(ctx_g[None])

    # Recurrent weights: [Wh_zr^T | Wh_tilda^T] as bf16 MXU operand, f32 bias.
    wh = jnp.concatenate([params["w_h2h_zr"].T, params["w_h2h_tilda"].T],
                         axis=1).astype(jnp.bfloat16)              # (H, 3H)
    bh = jnp.concatenate([params["b_h2h_zr"], params["b_h2h_tilda"]]
                         ).astype(f32).reshape(1, 3 * H)           # (1, 3H)

    # --- Time blocking: amortize per-grid-step overhead over TB steps ---------------
    tb = max(1, min(time_block, T))
    while T % tb:
        tb -= 1
    grid = (T // tb,)

    kernel = functools.partial(_ctx_gru_kernel, hidden_size=H, time_block=tb)

    out_shapes = (
        jax.ShapeDtypeStruct((T, B, H), x.dtype),   # per-step hidden outputs
        jax.ShapeDtypeStruct((B, H), x.dtype),      # final hidden state
    )

    grid_spec = pltpu.PrefetchScalarGridSpec(
        num_scalar_prefetch=0,
        grid=grid,
        in_specs=[
            pl.BlockSpec((tb, B, 3 * H), lambda t: (t, 0, 0)),   # xp block
            pl.BlockSpec((B, H), lambda t: (0, 0)),              # h0
            pl.BlockSpec((H, 3 * H), lambda t: (0, 0)),          # Wh^T (bf16)
            pl.BlockSpec((1, 3 * H), lambda t: (0, 0)),          # bh
        ],
        out_specs=[
            pl.BlockSpec((tb, B, H), lambda t: (t, 0, 0)),       # output block
            pl.BlockSpec((B, H), lambda t: (0, 0)),              # final h (last step)
        ],
        scratch_shapes=[
            pltpu.VMEM((B, H), jnp.float32),                     # h carry
        ],
    )

    output, h_last = pl.pallas_call(
        kernel,
        out_shape=out_shapes,
        grid_spec=grid_spec,
        compiler_params=pltpu.CompilerParams(
            dimension_semantics=("arbitrary",),   # recurrence: sequential over time
        ),
    )(xp, h0, wh, bh)

    if batch_first:
        output = jnp.transpose(output, (1, 0, 2))   # (B, T, H)
    return output, h_last


def _reference_forward(x, h0, ctx, params):
    """Pure-JAX reference mirroring the PyTorch recurrence (batch-first input).

    Uses the same bf16 recurrent-weight cast as the kernel so the comparison is tight.
    """
    H = h0.shape[-1]
    f32 = jnp.float32
    w_izr, b_izr = params["w_i2h_zr"].astype(f32), params["b_i2h_zr"].astype(f32)
    w_it, b_it = params["w_i2h_tilda"].astype(f32), params["b_i2h_tilda"].astype(f32)
    w_hzr, b_hzr = params["w_h2h_zr"].T.astype(jnp.bfloat16), params["b_h2h_zr"].astype(f32)
    w_ht, b_ht = params["w_h2h_tilda"].T.astype(jnp.bfloat16), params["b_h2h_tilda"].astype(f32)
    w_c, b_c = params["w_ctx2h"].astype(f32), params["b_ctx2h"].astype(f32)

    h = h0.astype(f32)
    ctx_g = ctx.astype(f32) @ w_c.T + b_c
    outs = []
    for t in range(x.shape[1]):
        x_t = x[:, t].astype(f32)
        i2h_zr = x_t @ w_izr.T + b_izr
        i2h_t = x_t @ w_it.T + b_it
        h_bf = h.astype(jnp.bfloat16)
        h2h_zr = jnp.dot(h_bf, w_hzr, preferred_element_type=f32) + b_hzr
        h2h_t = jnp.dot(h_bf, w_ht, preferred_element_type=f32) + b_ht
        zr = i2h_zr + h2h_zr + ctx_g
        r = jax.nn.sigmoid(zr[:, 0:H])
        z = jax.nn.sigmoid(zr[:, H:2 * H])
        h_tilda = jnp.tanh(i2h_t + r * h2h_t)
        h = z * h_tilda + (1.0 - z) * h
        outs.append(h)
    return jnp.stack(outs, axis=1), h


if __name__ == "__main__":
    # Small shapes consistent with the module's forward.
    B, T = 2, 8
    INPUT_SIZE, HIDDEN_SIZE, CTX_HIDDEN_SIZE = 16, 32, 16

    key = jax.random.PRNGKey(0)
    ks = jax.random.split(key, 14)

    params = {
        "w_i2h_zr":    0.1 * jax.random.normal(ks[0], (2 * HIDDEN_SIZE, INPUT_SIZE), jnp.float32),
        "b_i2h_zr":    0.1 * jax.random.normal(ks[1], (2 * HIDDEN_SIZE,), jnp.float32),
        "w_h2h_zr":    0.1 * jax.random.normal(ks[2], (2 * HIDDEN_SIZE, HIDDEN_SIZE), jnp.float32),
        "b_h2h_zr":    0.1 * jax.random.normal(ks[3], (2 * HIDDEN_SIZE,), jnp.float32),
        "w_i2h_tilda": 0.1 * jax.random.normal(ks[4], (HIDDEN_SIZE, INPUT_SIZE), jnp.float32),
        "b_i2h_tilda": 0.1 * jax.random.normal(ks[5], (HIDDEN_SIZE,), jnp.float32),
        "w_h2h_tilda": 0.1 * jax.random.normal(ks[6], (HIDDEN_SIZE, HIDDEN_SIZE), jnp.float32),
        "b_h2h_tilda": 0.1 * jax.random.normal(ks[7], (HIDDEN_SIZE,), jnp.float32),
        "w_ctx2h":     0.1 * jax.random.normal(ks[8], (2 * HIDDEN_SIZE, CTX_HIDDEN_SIZE), jnp.float32),
        "b_ctx2h":     0.1 * jax.random.normal(ks[9], (2 * HIDDEN_SIZE,), jnp.float32),
    }

    x = jax.random.normal(ks[10], (B, T, INPUT_SIZE), jnp.float32)      # batch-first input
    h0 = jax.random.normal(ks[11], (B, HIDDEN_SIZE), jnp.float32)
    ctx = jax.random.normal(ks[12], (B, CTX_HIDDEN_SIZE), jnp.float32)

    out, hT = context_gru_forward(x, h0, ctx, params, batch_first=True)
    jax.block_until_ready((out, hT))

    ref_out, ref_hT = _reference_forward(x, h0, ctx, params)
    assert out.shape == (B, T, HIDDEN_SIZE)
    assert hT.shape == (B, HIDDEN_SIZE)
    assert jnp.allclose(out, ref_out, atol=2e-3, rtol=2e-3)
    assert jnp.allclose(hT, ref_hT, atol=2e-3, rtol=2e-3)

    print("KERNEL_OK")
</pallas_src>

<mosaic_0001>
module attributes {stable_mosaic.version = 11 : i64} {
  func.func @_ctx_gru_kernel(%arg0: i32, %arg1: memref<8x2x96xf32, #tpu.memory_space<vmem>>, %arg2: memref<2x32xf32, #tpu.memory_space<vmem>>, %arg3: memref<32x96xbf16, #tpu.memory_space<vmem>>, %arg4: memref<1x96xf32, #tpu.memory_space<vmem>>, %arg5: memref<8x2x32xf32, #tpu.memory_space<vmem>>, %arg6: memref<2x32xf32, #tpu.memory_space<vmem>>, %arg7: memref<2x32xf32, #tpu.memory_space<vmem>>) attributes {dimension_semantics = [#tpu.dimension_semantics<arbitrary>], iteration_bounds = array<i64: 1>, scalar_prefetch = 0 : i64, scratch_operands = 1 : i64, tpu.core_type = #tpu.core_type<tc>, window_params = [{transform_indices = @transform_0, window_bounds = array<i64: 8, 2, 96>}, {pipeline_mode = #tpu.pipeline_mode<synchronous>, transform_indices = @transform_1, window_bounds = array<i64: 2, 32>}, {pipeline_mode = #tpu.pipeline_mode<synchronous>, transform_indices = @transform_2, window_bounds = array<i64: 32, 96>}, {pipeline_mode = #tpu.pipeline_mode<synchronous>, transform_indices = @transform_3, window_bounds = array<i64: 1, 96>}, {transform_indices = @transform_4, window_bounds = array<i64: 8, 2, 32>}, {pipeline_mode = #tpu.pipeline_mode<synchronous>, transform_indices = @transform_5, window_bounds = array<i64: 2, 32>}]} {
    %c0_i32 = arith.constant 0 : i32
    %0 = arith.cmpi eq, %arg0, %c0_i32 : i32
    %1 = arith.extui %0 : i1 to i32
    %c0_i32_0 = arith.constant 0 : i32
    %2 = arith.cmpi ne, %1, %c0_i32_0 : i32
    scf.if %2 {
      %c0_82 = arith.constant 0 : index
      %c0_83 = arith.constant 0 : index
      %276 = vector.load %arg2[%c0_82, %c0_83] : memref<2x32xf32, #tpu.memory_space<vmem>>, vector<2x32xf32>
      %c0_84 = arith.constant 0 : index
      %c0_85 = arith.constant 0 : index
      %277 = vector.load %arg7[%c0_84, %c0_85] : memref<2x32xf32, #tpu.memory_space<vmem>>, vector<2x32xf32>
      tpu.vector_store %arg7[%c0_84, %c0_85], %276 {strides = array<i32>} : memref<2x32xf32, #tpu.memory_space<vmem>>, vector<2x32xf32>,
    } else {
    }
    %c0 = arith.constant 0 : index
    %c0_1 = arith.constant 0 : index
    %3 = vector.load %arg7[%c0, %c0_1] : memref<2x32xf32, #tpu.memory_space<vmem>>, vector<2x32xf32>
    %c0_2 = arith.constant 0 : index
    %c0_3 = arith.constant 0 : index
    %4 = vector.load %arg3[%c0_2, %c0_3] : memref<32x96xbf16, #tpu.memory_space<vmem>>, vector<32x96xbf16>
    %c0_4 = arith.constant 0 : index
    %c0_5 = arith.constant 0 : index
    %5 = vector.load %arg4[%c0_4, %c0_5] : memref<1x96xf32, #tpu.memory_space<vmem>>, vector<1x96xf32>
    %6 = vector.shape_cast %5 : vector<1x96xf32> to vector<1x96xf32>
    %7 = vector.broadcast %6 : vector<1x96xf32> to vector<2x96xf32>
    %c0_6 = arith.constant 0 : index
    %c0_7 = arith.constant 0 : index
    %c0_8 = arith.constant 0 : index
    %8 = vector.load %arg1[%c0_6, %c0_7, %c0_8] : memref<8x2x96xf32, #tpu.memory_space<vmem>>, vector<1x2x96xf32>
    %9 = vector.shape_cast %8 : vector<1x2x96xf32> to vector<2x96xf32>
    %10 = arith.truncf %3 : vector<2x32xf32> to vector<2x32xbf16>
    %cst = arith.constant dense<0.000000e+00> : vector<2x96xf32>
    %11 = tpu.matmul %10, %4, %cst {dimension_numbers = #tpu.dot_dimension_numbers<[1], [0], [0], [1], [0, 0, 1, 1], [], []>} : vector<2x32xbf16>, vector<32x96xbf16>, vector<2x96xf32> -> vector<2x96xf32>
    %12 = arith.addf %11, %7 : vector<2x96xf32>
    %13 = vector.extract_strided_slice %9 {offsets = [0, 0], sizes = [2, 64], strides = [1, 1]} : vector<2x96xf32> to vector<2x64xf32>
    %14 = vector.extract_strided_slice %12 {offsets = [0, 0], sizes = [2, 64], strides = [1, 1]} : vector<2x96xf32> to vector<2x64xf32>
    %15 = arith.addf %13, %14 : vector<2x64xf32>
    %16 = vector.extract_strided_slice %15 {offsets = [0, 0], sizes = [2, 32], strides = [1, 1]} : vector<2x64xf32> to vector<2x32xf32>
    %17 = arith.negf %16 : vector<2x32xf32>
    %18 = math.exp %17 : vector<2x32xf32>
    %cst_9 = arith.constant 1.000000e+00 : f32
    %19 = vector.broadcast %cst_9 : f32 to vector<2x32xf32>
    %20 = arith.addf %19, %18 : vector<2x32xf32>
    %21 = arith.divf %19, %20 : vector<2x32xf32>
    %22 = vector.extract_strided_slice %15 {offsets = [0, 32], sizes = [2, 32], strides = [1, 1]} : vector<2x64xf32> to vector<2x32xf32>
    %23 = arith.negf %22 : vector<2x32xf32>
    %24 = math.exp %23 : vector<2x32xf32>
    %cst_10 = arith.constant 1.000000e+00 : f32
    %25 = vector.broadcast %cst_10 : f32 to vector<2x32xf32>
    %26 = arith.addf %25, %24 : vector<2x32xf32>
    %27 = arith.divf %25, %26 : vector<2x32xf32>
    %28 = vector.extract_strided_slice %9 {offsets = [0, 64], sizes = [2, 32], strides = [1, 1]} : vector<2x96xf32> to vector<2x32xf32>
    %29 = vector.extract_strided_slice %12 {offsets = [0, 64], sizes = [2, 32], strides = [1, 1]} : vector<2x96xf32> to vector<2x32xf32>
    %30 = arith.mulf %21, %29 : vector<2x32xf32>
    %31 = arith.addf %28, %30 : vector<2x32xf32>
    %32 = math.tanh %31 : vector<2x32xf32>
    %33 = arith.mulf %27, %32 : vector<2x32xf32>
    %cst_11 = arith.constant 1.000000e+00 : f32
    %34 = vector.broadcast %cst_11 : f32 to vector<2x32xf32>
    %35 = arith.subf %34, %27 : vector<2x32xf32>
    %36 = arith.mulf %35, %3 : vector<2x32xf32>
    %37 = arith.addf %33, %36 : vector<2x32xf32>
    %c0_12 = arith.constant 0 : index
    %c0_13 = arith.constant 0 : index
    %c0_14 = arith.constant 0 : index
    %38 = vector.load %arg5[%c0_12, %c0_13, %c0_14] : memref<8x2x32xf32, #tpu.memory_space<vmem>>, vector<1x2x32xf32>
    %39 = vector.shape_cast %38 : vector<1x2x32xf32> to vector<2x32xf32>
    %40 = vector.shape_cast %37 : vector<2x32xf32> to vector<1x2x32xf32>
    tpu.vector_store %arg5[%c0_12, %c0_13, %c0_14], %40 {strides = array<i32>} : memref<8x2x32xf32, #tpu.memory_space<vmem>>, vector<1x2x32xf32>,
    %c1 = arith.constant 1 : index
    %c0_15 = arith.constant 0 : index
    %c0_16 = arith.constant 0 : index
    %41 = vector.load %arg1[%c1, %c0_15, %c0_16] : memref<8x2x96xf32, #tpu.memory_space<vmem>>, vector<1x2x96xf32>
    %42 = vector.shape_cast %41 : vector<1x2x96xf32> to vector<2x96xf32>
    %43 = arith.truncf %37 : vector<2x32xf32> to vector<2x32xbf16>
    %cst_17 = arith.constant dense<0.000000e+00> : vector<2x96xf32>
    %44 = tpu.matmul %43, %4, %cst_17 {dimension_numbers = #tpu.dot_dimension_numbers<[1], [0], [0], [1], [0, 0, 1, 1], [], []>} : vector<2x32xbf16>, vector<32x96xbf16>, vector<2x96xf32> -> vector<2x96xf32>
    %45 = arith.addf %44, %7 : vector<2x96xf32>
    %46 = vector.extract_strided_slice %42 {offsets = [0, 0], sizes = [2, 64], strides = [1, 1]} : vector<2x96xf32> to vector<2x64xf32>
    %47 = vector.extract_strided_slice %45 {offsets = [0, 0], sizes = [2, 64], strides = [1, 1]} : vector<2x96xf32> to vector<2x64xf32>
    %48 = arith.addf %46, %47 : vector<2x64xf32>
    %49 = vector.extract_strided_slice %48 {offsets = [0, 0], sizes = [2, 32], strides = [1, 1]} : vector<2x64xf32> to vector<2x32xf32>
    %50 = arith.negf %49 : vector<2x32xf32>
    %51 = math.exp %50 : vector<2x32xf32>
    %cst_18 = arith.constant 1.000000e+00 : f32
    %52 = vector.broadcast %cst_18 : f32 to vector<2x32xf32>
    %53 = arith.addf %52, %51 : vector<2x32xf32>
    %54 = arith.divf %52, %53 : vector<2x32xf32>
    %55 = vector.extract_strided_slice %48 {offsets = [0, 32], sizes = [2, 32], strides = [1, 1]} : vector<2x64xf32> to vector<2x32xf32>
    %56 = arith.negf %55 : vector<2x32xf32>
    %57 = math.exp %56 : vector<2x32xf32>
    %cst_19 = arith.constant 1.000000e+00 : f32
    %58 = vector.broadcast %cst_19 : f32 to vector<2x32xf32>
    %59 = arith.addf %58, %57 : vector<2x32xf32>
    %60 = arith.divf %58, %59 : vector<2x32xf32>
    %61 = vector.extract_strided_slice %42 {offsets = [0, 64], sizes = [2, 32], strides = [1, 1]} : vector<2x96xf32> to vector<2x32xf32>
    %62 = vector.extract_strided_slice %45 {offsets = [0, 64], sizes = [2, 32], strides = [1, 1]} : vector<2x96xf32> to vector<2x32xf32>
    %63 = arith.mulf %54, %62 : vector<2x32xf32>
    %64 = arith.addf %61, %63 : vector<2x32xf32>
    %65 = math.tanh %64 : vector<2x32xf32>
    %66 = arith.mulf %60, %65 : vector<2x32xf32>
    %cst_20 = arith.constant 1.000000e+00 : f32
    %67 = vector.broadcast %cst_20 : f32 to vector<2x32xf32>
    %68 = arith.subf %67, %60 : vector<2x32xf32>
    %69 = arith.mulf %68, %37 : vector<2x32xf32>
    %70 = arith.addf %66, %69 : vector<2x32xf32>
    %c1_21 = arith.constant 1 : index
    %c0_22 = arith.constant 0 : index
    %c0_23 = arith.constant 0 : index
    %71 = vector.load %arg5[%c1_21, %c0_22, %c0_23] : memref<8x2x32xf32, #tpu.memory_space<vmem>>, vector<1x2x32xf32>
    %72 = vector.shape_cast %71 : vector<1x2x32xf32> to vector<2x32xf32>
    %73 = vector.shape_cast %70 : vector<2x32xf32> to vector<1x2x32xf32>
    tpu.vector_store %arg5[%c1_21, %c0_22, %c0_23], %73 {strides = array<i32>} : memref<8x2x32xf32, #tpu.memory_space<vmem>>, vector<1x2x32xf32>,
    %c2 = arith.constant 2 : index
    %c0_24 = arith.constant 0 : index
    %c0_25 = arith.constant 0 : index
    %74 = vector.load %arg1[%c2, %c0_24, %c0_25] : memref<8x2x96xf32, #tpu.memory_space<vmem>>, vector<1x2x96xf32>
    %75 = vector.shape_cast %74 : vector<1x2x96xf32> to vector<2x96xf32>
    %76 = arith.truncf %70 : vector<2x32xf32> to vector<2x32xbf16>
    %cst_26 = arith.constant dense<0.000000e+00> : vector<2x96xf32>
    %77 = tpu.matmul %76, %4, %cst_26 {dimension_numbers = #tpu.dot_dimension_numbers<[1], [0], [0], [1], [0, 0, 1, 1], [], []>} : vector<2x32xbf16>, vector<32x96xbf16>, vector<2x96xf32> -> vector<2x96xf32>
    %78 = arith.addf %77, %7 : vector<2x96xf32>
    %79 = vector.extract_strided_slice %75 {offsets = [0, 0], sizes = [2, 64], strides = [1, 1]} : vector<2x96xf32> to vector<2x64xf32>
    %80 = vector.extract_strided_slice %78 {offsets = [0, 0], sizes = [2, 64], strides = [1, 1]} : vector<2x96xf32> to vector<2x64xf32>
    %81 = arith.addf %79, %80 : vector<2x64xf32>
    %82 = vector.extract_strided_slice %81 {offsets = [0, 0], sizes = [2, 32], strides = [1, 1]} : vector<2x64xf32> to vector<2x32xf32>
    %83 = arith.negf %82 : vector<2x32xf32>
    %84 = math.exp %83 : vector<2x32xf32>
    %cst_27 = arith.constant 1.000000e+00 : f32
    %85 = vector.broadcast %cst_27 : f32 to vector<2x32xf32>
    %86 = arith.addf %85, %84 : vector<2x32xf32>
    %87 = arith.divf %85, %86 : vector<2x32xf32>
    %88 = vector.extract_strided_slice %81 {offsets = [0, 32], sizes = [2, 32], strides = [1, 1]} : vector<2x64xf32> to vector<2x32xf32>
    %89 = arith.negf %88 : vector<2x32xf32>
    %90 = math.exp %89 : vector<2x32xf32>
    %cst_28 = arith.constant 1.000000e+00 : f32
    %91 = vector.broadcast %cst_28 : f32 to vector<2x32xf32>
    %92 = arith.addf %91, %90 : vector<2x32xf32>
    %93 = arith.divf %91, %92 : vector<2x32xf32>
    %94 = vector.extract_strided_slice %75 {offsets = [0, 64], sizes = [2, 32], strides = [1, 1]} : vector<2x96xf32> to vector<2x32xf32>
    %95 = vector.extract_strided_slice %78 {offsets = [0, 64], sizes = [2, 32], strides = [1, 1]} : vector<2x96xf32> to vector<2x32xf32>
    %96 = arith.mulf %87, %95 : vector<2x32xf32>
    %97 = arith.addf %94, %96 : vector<2x32xf32>
    %98 = math.tanh %97 : vector<2x32xf32>
    %99 = arith.mulf %93, %98 : vector<2x32xf32>
    %cst_29 = arith.constant 1.000000e+00 : f32
    %100 = vector.broadcast %cst_29 : f32 to vector<2x32xf32>
    %101 = arith.subf %100, %93 : vector<2x32xf32>
    %102 = arith.mulf %101, %70 : vector<2x32xf32>
    %103 = arith.addf %99, %102 : vector<2x32xf32>
    %c2_30 = arith.constant 2 : index
    %c0_31 = arith.constant 0 : index
    %c0_32 = arith.constant 0 : index
    %104 = vector.load %arg5[%c2_30, %c0_31, %c0_32] : memref<8x2x32xf32, #tpu.memory_space<vmem>>, vector<1x2x32xf32>
    %105 = vector.shape_cast %104 : vector<1x2x32xf32> to vector<2x32xf32>
    %106 = vector.shape_cast %103 : vector<2x32xf32> to vector<1x2x32xf32>
    tpu.vector_store %arg5[%c2_30, %c0_31, %c0_32], %106 {strides = array<i32>} : memref<8x2x32xf32, #tpu.memory_space<vmem>>, vector<1x2x32xf32>,
    %c3 = arith.constant 3 : index
    %c0_33 = arith.constant 0 : index
    %c0_34 = arith.constant 0 : index
    %107 = vector.load %arg1[%c3, %c0_33, %c0_34] : memref<8x2x96xf32, #tpu.memory_space<vmem>>, vector<1x2x96xf32>
    %108 = vector.shape_cast %107 : vector<1x2x96xf32> to vector<2x96xf32>
    %109 = arith.truncf %103 : vector<2x32xf32> to vector<2x32xbf16>
    %cst_35 = arith.constant dense<0.000000e+00> : vector<2x96xf32>
    %110 = tpu.matmul %109, %4, %cst_35 {dimension_numbers = #tpu.dot_dimension_numbers<[1], [0], [0], [1], [0, 0, 1, 1], [], []>} : vector<2x32xbf16>, vector<32x96xbf16>, vector<2x96xf32> -> vector<2x96xf32>
    %111 = arith.addf %110, %7 : vector<2x96xf32>
    %112 = vector.extract_strided_slice %108 {offsets = [0, 0], sizes = [2, 64], strides = [1, 1]} : vector<2x96xf32> to vector<2x64xf32>
    %113 = vector.extract_strided_slice %111 {offsets = [0, 0], sizes = [2, 64], strides = [1, 1]} : vector<2x96xf32> to vector<2x64xf32>
    %114 = arith.addf %112, %113 : vector<2x64xf32>
    %115 = vector.extract_strided_slice %114 {offsets = [0, 0], sizes = [2, 32], strides = [1, 1]} : vector<2x64xf32> to vector<2x32xf32>
    %116 = arith.negf %115 : vector<2x32xf32>
    %117 = math.exp %116 : vector<2x32xf32>
    %cst_36 = arith.constant 1.000000e+00 : f32
    %118 = vector.broadcast %cst_36 : f32 to vector<2x32xf32>
    %119 = arith.addf %118, %117 : vector<2x32xf32>
    %120 = arith.divf %118, %119 : vector<2x32xf32>
    %121 = vector.extract_strided_slice %114 {offsets = [0, 32], sizes = [2, 32], strides = [1, 1]} : vector<2x64xf32> to vector<2x32xf32>
    %122 = arith.negf %121 : vector<2x32xf32>
    %123 = math.exp %122 : vector<2x32xf32>
    %cst_37 = arith.constant 1.000000e+00 : f32
    %124 = vector.broadcast %cst_37 : f32 to vector<2x32xf32>
    %125 = arith.addf %124, %123 : vector<2x32xf32>
    %126 = arith.divf %124, %125 : vector<2x32xf32>
    %127 = vector.extract_strided_slice %108 {offsets = [0, 64], sizes = [2, 32], strides = [1, 1]} : vector<2x96xf32> to vector<2x32xf32>
    %128 = vector.extract_strided_slice %111 {offsets = [0, 64], sizes = [2, 32], strides = [1, 1]} : vector<2x96xf32> to vector<2x32xf32>
    %129 = arith.mulf %120, %128 : vector<2x32xf32>
    %130 = arith.addf %127, %129 : vector<2x32xf32>
    %131 = math.tanh %130 : vector<2x32xf32>
    %132 = arith.mulf %126, %131 : vector<2x32xf32>
    %cst_38 = arith.constant 1.000000e+00 : f32
    %133 = vector.broadcast %cst_38 : f32 to vector<2x32xf32>
    %134 = arith.subf %133, %126 : vector<2x32xf32>
    %135 = arith.mulf %134, %103 : vector<2x32xf32>
    %136 = arith.addf %132, %135 : vector<2x32xf32>
    %c3_39 = arith.constant 3 : index
    %c0_40 = arith.constant 0 : index
    %c0_41 = arith.constant 0 : index
    %137 = vector.load %arg5[%c3_39, %c0_40, %c0_41] : memref<8x2x32xf32, #tpu.memory_space<vmem>>, vector<1x2x32xf32>
    %138 = vector.shape_cast %137 : vector<1x2x32xf32> to vector<2x32xf32>
    %139 = vector.shape_cast %136 : vector<2x32xf32> to vector<1x2x32xf32>
    tpu.vector_store %arg5[%c3_39, %c0_40, %c0_41], %139 {strides = array<i32>} : memref<8x2x32xf32, #tpu.memory_space<vmem>>, vector<1x2x32xf32>,
    %c4 = arith.constant 4 : index
    %c0_42 = arith.constant 0 : index
    %c0_43 = arith.constant 0 : index
    %140 = vector.load %arg1[%c4, %c0_42, %c0_43] : memref<8x2x96xf32, #tpu.memory_space<vmem>>, vector<1x2x96xf32>
    %141 = vector.shape_cast %140 : vector<1x2x96xf32> to vector<2x96xf32>
    %142 = arith.truncf %136 : vector<2x32xf32> to vector<2x32xbf16>
    %cst_44 = arith.constant dense<0.000000e+00> : vector<2x96xf32>
    %143 = tpu.matmul %142, %4, %cst_44 {dimension_numbers = #tpu.dot_dimension_numbers<[1], [0], [0], [1], [0, 0, 1, 1], [], []>} : vector<2x32xbf16>, vector<32x96xbf16>, vector<2x96xf32> -> vector<2x96xf32>
    %144 = arith.addf %143, %7 : vector<2x96xf32>
    %145 = vector.extract_strided_slice %141 {offsets = [0, 0], sizes = [2, 64], strides = [1, 1]} : vector<2x96xf32> to vector<2x64xf32>
    %146 = vector.extract_strided_slice %144 {offsets = [0, 0], sizes = [2, 64], strides = [1, 1]} : vector<2x96xf32> to vector<2x64xf32>
    %147 = arith.addf %145, %146 : vector<2x64xf32>
    %148 = vector.extract_strided_slice %147 {offsets = [0, 0], sizes = [2, 32], strides = [1, 1]} : vector<2x64xf32> to vector<2x32xf32>
    %149 = arith.negf %148 : vector<2x32xf32>
    %150 = math.exp %149 : vector<2x32xf32>
    %cst_45 = arith.constant 1.000000e+00 : f32
    %151 = vector.broadcast %cst_45 : f32 to vector<2x32xf32>
    %152 = arith.addf %151, %150 : vector<2x32xf32>
    %153 = arith.divf %151, %152 : vector<2x32xf32>
    %154 = vector.extract_strided_slice %147 {offsets = [0, 32], sizes = [2, 32], strides = [1, 1]} : vector<2x64xf32> to vector<2x32xf32>
    %155 = arith.negf %154 : vector<2x32xf32>
    %156 = math.exp %155 : vector<2x32xf32>
    %cst_46 = arith.constant 1.000000e+00 : f32
    %157 = vector.broadcast %cst_46 : f32 to vector<2x32xf32>
    %158 = arith.addf %157, %156 : vector<2x32xf32>
    %159 = arith.divf %157, %158 : vector<2x32xf32>
    %160 = vector.extract_strided_slice %141 {offsets = [0, 64], sizes = [2, 32], strides = [1, 1]} : vector<2x96xf32> to vector<2x32xf32>
    %161 = vector.extract_strided_slice %144 {offsets = [0, 64], sizes = [2, 32], strides = [1, 1]} : vector<2x96xf32> to vector<2x32xf32>
    %162 = arith.mulf %153, %161 : vector<2x32xf32>
    %163 = arith.addf %160, %162 : vector<2x32xf32>
    %164 = math.tanh %163 : vector<2x32xf32>
    %165 = arith.mulf %159, %164 : vector<2x32xf32>
    %cst_47 = arith.constant 1.000000e+00 : f32
    %166 = vector.broadcast %cst_47 : f32 to vector<2x32xf32>
    %167 = arith.subf %166, %159 : vector<2x32xf32>
    %168 = arith.mulf %167, %136 : vector<2x32xf32>
    %169 = arith.addf %165, %168 : vector<2x32xf32>
    %c4_48 = arith.constant 4 : index
    %c0_49 = arith.constant 0 : index
    %c0_50 = arith.constant 0 : index
    %170 = vector.load %arg5[%c4_48, %c0_49, %c0_50] : memref<8x2x32xf32, #tpu.memory_space<vmem>>, vector<1x2x32xf32>
    %171 = vector.shape_cast %170 : vector<1x2x32xf32> to vector<2x32xf32>
    %172 = vector.shape_cast %169 : vector<2x32xf32> to vector<1x2x32xf32>
    tpu.vector_store %arg5[%c4_48, %c0_49, %c0_50], %172 {strides = array<i32>} : memref<8x2x32xf32, #tpu.memory_space<vmem>>, vector<1x2x32xf32>,
    %c5 = arith.constant 5 : index
    %c0_51 = arith.constant 0 : index
    %c0_52 = arith.constant 0 : index
    %173 = vector.load %arg1[%c5, %c0_51, %c0_52] : memref<8x2x96xf32, #tpu.memory_space<vmem>>, vector<1x2x96xf32>
    %174 = vector.shape_cast %173 : vector<1x2x96xf32> to vector<2x96xf32>
    %175 = arith.truncf %169 : vector<2x32xf32> to vector<2x32xbf16>
    %cst_53 = arith.constant dense<0.000000e+00> : vector<2x96xf32>
    %176 = tpu.matmul %175, %4, %cst_53 {dimension_numbers = #tpu.dot_dimension_numbers<[1], [0], [0], [1], [0, 0, 1, 1], [], []>} : vector<2x32xbf16>, vector<32x96xbf16>, vector<2x96xf32> -> vector<2x96xf32>
    %177 = arith.addf %176, %7 : vector<2x96xf32>
    %178 = vector.extract_strided_slice %174 {offsets = [0, 0], sizes = [2, 64], strides = [1, 1]} : vector<2x96xf32> to vector<2x64xf32>
    %179 = vector.extract_strided_slice %177 {offsets = [0, 0], sizes = [2, 64], strides = [1, 1]} : vector<2x96xf32> to vector<2x64xf32>
    %180 = arith.addf %178, %179 : vector<2x64xf32>
    %181 = vector.extract_strided_slice %180 {offsets = [0, 0], sizes = [2, 32], strides = [1, 1]} : vector<2x64xf32> to vector<2x32xf32>
    %182 = arith.negf %181 : vector<2x32xf32>
    %183 = math.exp %182 : vector<2x32xf32>
    %cst_54 = arith.constant 1.000000e+00 : f32
    %184 = vector.broadcast %cst_54 : f32 to vector<2x32xf32>
    %185 = arith.addf %184, %183 : vector<2x32xf32>
    %186 = arith.divf %184, %185 : vector<2x32xf32>
    %187 = vector.extract_strided_slice %180 {offsets = [0, 32], sizes = [2, 32], strides = [1, 1]} : vector<2x64xf32> to vector<2x32xf32>
    %188 = arith.negf %187 : vector<2x32xf32>
    %189 = math.exp %188 : vector<2x32xf32>
    %cst_55 = arith.constant 1.000000e+00 : f32
    %190 = vector.broadcast %cst_55 : f32 to vector<2x32xf32>
    %191 = arith.addf %190, %189 : vector<2x32xf32>
    %192 = arith.divf %190, %191 : vector<2x32xf32>
    %193 = vector.extract_strided_slice %174 {offsets = [0, 64], sizes = [2, 32], strides = [1, 1]} : vector<2x96xf32> to vector<2x32xf32>
    %194 = vector.extract_strided_slice %177 {offsets = [0, 64], sizes = [2, 32], strides = [1, 1]} : vector<2x96xf32> to vector<2x32xf32>
    %195 = arith.mulf %186, %194 : vector<2x32xf32>
    %196 = arith.addf %193, %195 : vector<2x32xf32>
    %197 = math.tanh %196 : vector<2x32xf32>
    %198 = arith.mulf %192, %197 : vector<2x32xf32>
    %cst_56 = arith.constant 1.000000e+00 : f32
    %199 = vector.broadcast %cst_56 : f32 to vector<2x32xf32>
    %200 = arith.subf %199, %192 : vector<2x32xf32>
    %201 = arith.mulf %200, %169 : vector<2x32xf32>
    %202 = arith.addf %198, %201 : vector<2x32xf32>
    %c5_57 = arith.constant 5 : index
    %c0_58 = arith.constant 0 : index
    %c0_59 = arith.constant 0 : index
    %203 = vector.load %arg5[%c5_57, %c0_58, %c0_59] : memref<8x2x32xf32, #tpu.memory_space<vmem>>, vector<1x2x32xf32>
    %204 = vector.shape_cast %203 : vector<1x2x32xf32> to vector<2x32xf32>
    %205 = vector.shape_cast %202 : vector<2x32xf32> to vector<1x2x32xf32>
    tpu.vector_store %arg5[%c5_57, %c0_58, %c0_59], %205 {strides = array<i32>} : memref<8x2x32xf32, #tpu.memory_space<vmem>>, vector<1x2x32xf32>,
    %c6 = arith.constant 6 : index
    %c0_60 = arith.constant 0 : index
    %c0_61 = arith.constant 0 : index
    %206 = vector.load %arg1[%c6, %c0_60, %c0_61] : memref<8x2x96xf32, #tpu.memory_space<vmem>>, vector<1x2x96xf32>
    %207 = vector.shape_cast %206 : vector<1x2x96xf32> to vector<2x96xf32>
    %208 = arith.truncf %202 : vector<2x32xf32> to vector<2x32xbf16>
    %cst_62 = arith.constant dense<0.000000e+00> : vector<2x96xf32>
    %209 = tpu.matmul %208, %4, %cst_62 {dimension_numbers = #tpu.dot_dimension_numbers<[1], [0], [0], [1], [0, 0, 1, 1], [], []>} : vector<2x32xbf16>, vector<32x96xbf16>, vector<2x96xf32> -> vector<2x96xf32>
    %210 = arith.addf %209, %7 : vector<2x96xf32>
    %211 = vector.extract_strided_slice %207 {offsets = [0, 0], sizes = [2, 64], strides = [1, 1]} : vector<2x96xf32> to vector<2x64xf32>
    %212 = vector.extract_strided_slice %210 {offsets = [0, 0], sizes = [2, 64], strides = [1, 1]} : vector<2x96xf32> to vector<2x64xf32>
    %213 = arith.addf %211, %212 : vector<2x64xf32>
    %214 = vector.extract_strided_slice %213 {offsets = [0, 0], sizes = [2, 32], strides = [1, 1]} : vector<2x64xf32> to vector<2x32xf32>
    %215 = arith.negf %214 : vector<2x32xf32>
    %216 = math.exp %215 : vector<2x32xf32>
    %cst_63 = arith.constant 1.000000e+00 : f32
    %217 = vector.broadcast %cst_63 : f32 to vector<2x32xf32>
    %218 = arith.addf %217, %216 : vector<2x32xf32>
    %219 = arith.divf %217, %218 : vector<2x32xf32>
    %220 = vector.extract_strided_slice %213 {offsets = [0, 32], sizes = [2, 32], strides = [1, 1]} : vector<2x64xf32> to vector<2x32xf32>
    %221 = arith.negf %220 : vector<2x32xf32>
    %222 = math.exp %221 : vector<2x32xf32>
    %cst_64 = arith.constant 1.000000e+00 : f32
    %223 = vector.broadcast %cst_64 : f32 to vector<2x32xf32>
    %224 = arith.addf %223, %222 : vector<2x32xf32>
    %225 = arith.divf %223, %224 : vector<2x32xf32>
    %226 = vector.extract_strided_slice %207 {offsets = [0, 64], sizes = [2, 32], strides = [1, 1]} : vector<2x96xf32> to vector<2x32xf32>
    %227 = vector.extract_strided_slice %210 {offsets = [0, 64], sizes = [2, 32], strides = [1, 1]} : vector<2x96xf32> to vector<2x32xf32>
    %228 = arith.mulf %219, %227 : vector<2x32xf32>
    %229 = arith.addf %226, %228 : vector<2x32xf32>
    %230 = math.tanh %229 : vector<2x32xf32>
    %231 = arith.mulf %225, %230 : vector<2x32xf32>
    %cst_65 = arith.constant 1.000000e+00 : f32
    %232 = vector.broadcast %cst_65 : f32 to vector<2x32xf32>
    %233 = arith.subf %232, %225 : vector<2x32xf32>
    %234 = arith.mulf %233, %202 : vector<2x32xf32>
    %235 = arith.addf %231, %234 : vector<2x32xf32>
    %c6_66 = arith.constant 6 : index
    %c0_67 = arith.constant 0 : index
    %c0_68 = arith.constant 0 : index
    %236 = vector.load %arg5[%c6_66, %c0_67, %c0_68] : memref<8x2x32xf32, #tpu.memory_space<vmem>>, vector<1x2x32xf32>
    %237 = vector.shape_cast %236 : vector<1x2x32xf32> to vector<2x32xf32>
    %238 = vector.shape_cast %235 : vector<2x32xf32> to vector<1x2x32xf32>
    tpu.vector_store %arg5[%c6_66, %c0_67, %c0_68], %238 {strides = array<i32>} : memref<8x2x32xf32, #tpu.memory_space<vmem>>, vector<1x2x32xf32>,
    %c7 = arith.constant 7 : index
    %c0_69 = arith.constant 0 : index
    %c0_70 = arith.constant 0 : index
    %239 = vector.load %arg1[%c7, %c0_69, %c0_70] : memref<8x2x96xf32, #tpu.memory_space<vmem>>, vector<1x2x96xf32>
    %240 = vector.shape_cast %239 : vector<1x2x96xf32> to vector<2x96xf32>
    %241 = arith.truncf %235 : vector<2x32xf32> to vector<2x32xbf16>
    %cst_71 = arith.constant dense<0.000000e+00> : vector<2x96xf32>
    %242 = tpu.matmul %241, %4, %cst_71 {dimension_numbers = #tpu.dot_dimension_numbers<[1], [0], [0], [1], [0, 0, 1, 1], [], []>} : vector<2x32xbf16>, vector<32x96xbf16>, vector<2x96xf32> -> vector<2x96xf32>
    %243 = arith.addf %242, %7 : vector<2x96xf32>
    %244 = vector.extract_strided_slice %240 {offsets = [0, 0], sizes = [2, 64], strides = [1, 1]} : vector<2x96xf32> to vector<2x64xf32>
    %245 = vector.extract_strided_slice %243 {offsets = [0, 0], sizes = [2, 64], strides = [1, 1]} : vector<2x96xf32> to vector<2x64xf32>
    %246 = arith.addf %244, %245 : vector<2x64xf32>
    %247 = vector.extract_strided_slice %246 {offsets = [0, 0], sizes = [2, 32], strides = [1, 1]} : vector<2x64xf32> to vector<2x32xf32>
    %248 = arith.negf %247 : vector<2x32xf32>
    %249 = math.exp %248 : vector<2x32xf32>
    %cst_72 = arith.constant 1.000000e+00 : f32
    %250 = vector.broadcast %cst_72 : f32 to vector<2x32xf32>
    %251 = arith.addf %250, %249 : vector<2x32xf32>
    %252 = arith.divf %250, %251 : vector<2x32xf32>
    %253 = vector.extract_strided_slice %246 {offsets = [0, 32], sizes = [2, 32], strides = [1, 1]} : vector<2x64xf32> to vector<2x32xf32>
    %254 = arith.negf %253 : vector<2x32xf32>
    %255 = math.exp %254 : vector<2x32xf32>
    %cst_73 = arith.constant 1.000000e+00 : f32
    %256 = vector.broadcast %cst_73 : f32 to vector<2x32xf32>
    %257 = arith.addf %256, %255 : vector<2x32xf32>
    %258 = arith.divf %256, %257 : vector<2x32xf32>
    %259 = vector.extract_strided_slice %240 {offsets = [0, 64], sizes = [2, 32], strides = [1, 1]} : vector<2x96xf32> to vector<2x32xf32>
    %260 = vector.extract_strided_slice %243 {offsets = [0, 64], sizes = [2, 32], strides = [1, 1]} : vector<2x96xf32> to vector<2x32xf32>
    %261 = arith.mulf %252, %260 : vector<2x32xf32>
    %262 = arith.addf %259, %261 : vector<2x32xf32>
    %263 = math.tanh %262 : vector<2x32xf32>
    %264 = arith.mulf %258, %263 : vector<2x32xf32>
    %cst_74 = arith.constant 1.000000e+00 : f32
    %265 = vector.broadcast %cst_74 : f32 to vector<2x32xf32>
    %266 = arith.subf %265, %258 : vector<2x32xf32>
    %267 = arith.mulf %266, %235 : vector<2x32xf32>
    %268 = arith.addf %264, %267 : vector<2x32xf32>
    %c7_75 = arith.constant 7 : index
    %c0_76 = arith.constant 0 : index
    %c0_77 = arith.constant 0 : index
    %269 = vector.load %arg5[%c7_75, %c0_76, %c0_77] : memref<8x2x32xf32, #tpu.memory_space<vmem>>, vector<1x2x32xf32>
    %270 = vector.shape_cast %269 : vector<1x2x32xf32> to vector<2x32xf32>
    %271 = vector.shape_cast %268 : vector<2x32xf32> to vector<1x2x32xf32>
    tpu.vector_store %arg5[%c7_75, %c0_76, %c0_77], %271 {strides = array<i32>} : memref<8x2x32xf32, #tpu.memory_space<vmem>>, vector<1x2x32xf32>,
    %c0_78 = arith.constant 0 : index
    %c0_79 = arith.constant 0 : index
    %272 = vector.load %arg7[%c0_78, %c0_79] : memref<2x32xf32, #tpu.memory_space<vmem>>, vector<2x32xf32>
    tpu.vector_store %arg7[%c0_78, %c0_79], %268 {strides = array<i32>} : memref<2x32xf32, #tpu.memory_space<vmem>>, vector<2x32xf32>,
    %c0_i32_80 = arith.constant 0 : i32
    %273 = arith.cmpi eq, %arg0, %c0_i32_80 : i32
    %274 = arith.extui %273 : i1 to i32
    %c0_i32_81 = arith.constant 0 : i32
    %275 = arith.cmpi ne, %274, %c0_i32_81 : i32
    scf.if %275 {
      %c0_82 = arith.constant 0 : index
      %c0_83 = arith.constant 0 : index
      %276 = vector.load %arg6[%c0_82, %c0_83] : memref<2x32xf32, #tpu.memory_space<vmem>>, vector<2x32xf32>
      tpu.vector_store %arg6[%c0_82, %c0_83], %268 {strides = array<i32>} : memref<2x32xf32, #tpu.memory_space<vmem>>, vector<2x32xf32>,
    } else {
    }
    return
  }
  func.func @transform_0(%arg0: i32) -> (i32, i32, i32) {
    %c0_i32 = arith.constant 0 : i32
    %c0_i32_0 = arith.constant 0 : i32
    %c0_i32_1 = arith.constant 0 : i32
    return %arg0, %c0_i32, %c0_i32_0 : i32, i32, i32
  }
  func.func @transform_1(%arg0: i32) -> (i32, i32) {
    %c0_i32 = arith.constant 0 : i32
    %c0_i32_0 = arith.constant 0 : i32
    %c0_i32_1 = arith.constant 0 : i32
    return %c0_i32, %c0_i32_0 : i32, i32
  }
  func.func @transform_2(%arg0: i32) -> (i32, i32) {
    %c0_i32 = arith.constant 0 : i32
    %c0_i32_0 = arith.constant 0 : i32
    %c0_i32_1 = arith.constant 0 : i32
    return %c0_i32, %c0_i32_0 : i32, i32
  }
  func.func @transform_3(%arg0: i32) -> (i32, i32) {
    %c0_i32 = arith.constant 0 : i32
    %c0_i32_0 = arith.constant 0 : i32
    %c0_i32_1 = arith.constant 0 : i32
    return %c0_i32, %c0_i32_0 : i32, i32
  }
  func.func @transform_4(%arg0: i32) -> (i32, i32, i32) {
    %c0_i32 = arith.constant 0 : i32
    %c0_i32_0 = arith.constant 0 : i32
    %c0_i32_1 = arith.constant 0 : i32
    return %arg0, %c0_i32, %c0_i32_0 : i32, i32, i32
  }
  func.func @transform_5(%arg0: i32) -> (i32, i32) {
    %c0_i32 = arith.constant 0 : i32
    %c0_i32_0 = arith.constant 0 : i32
    %c0_i32_1 = arith.constant 0 : i32
    return %c0_i32, %c0_i32_0 : i32, i32
  }
}

</mosaic_0001>

<bundles_post_ra>
// kernel: tpu_custom_call.1
= control target key start
LH: loop header
LB: loop body
LE: loop exit
PB: predicated region body
PF: predicated region fallthrough
CT: control target
= control target key end

     0   :  { %11 = vsyncpa [#allocation4], 0  ;;  %s1298_s0 = inlined_call_operand.hbm [shape: f32[8,2,96], index: 0, kind: input, shape index: {}]   ;;  %s1299_s1 = inlined_call_operand.vmem [shape: f32[2,32], index: 1, kind: input, shape index: {}]   ;;  %s1300_s2 = inlined_call_operand.hbm [shape: bf16[32,96], index: 2, kind: input, shape index: {}]   ;;  %s1301_s3 = inlined_call_operand.vmem [shape: f32[1,96], index: 3, kind: input, shape index: {}]   ;;  %s1302_s4 = inlined_call_operand.hbm [shape: f32[8,2,32], index: 4, kind: output, shape index: {0}]   ;;  %s1303_s5 = inlined_call_operand.hbm [shape: f32[2,32], index: 5, kind: output, shape index: {1}]  }
   0x1   :  { %12 = vsyncpa [#allocation7], 0 }
   0x2   :  { %13 = vsyncpa [#allocation5], 0 }
   0x3   :  { %14 = vsyncpa [#allocation10], 0  ;;  %s1031_s18 = smov [#allocation3]   ;;  %s935_s22 = scalar_lea.hbm %s1298_s0, 256 }
   0x4   :  { %s20_s19 = sshll.u32 %s1031_s18, 4  ;;  %p936_p0 = scmp.ne.s32.totalorder %s1298_s0, %s935_s22  ;;  %s21_s19 = int_to_ptr.vmem [resolvable:$true] %s20_s19 }
   0x5   :  { %p939_p1 = scmp.lt.u32.totalorder %s935_s22, %s1298_s0 }
   0x7   :  { %p941_p2 = pnand %p939_p1, %p936_p0 }
   0x9   :  { %944 = shalt.err (!%p941_p2)
}
   0xa   :  { %s945_s27 = scalar_lea.vmem %s21_s19, 256  ;;  %p950_p4 = scmp.lt.s32.totalorder %s21_s19, %s21_s19 }
   0xb   :  { %p946_p3 = scmp.ne.s32.totalorder %s21_s19, %s945_s27  ;;  %p951_p5 = scmp.lt.s32.totalorder %s945_s27, %s945_s27 }
   0xd   :  { %p952_p6 = por %p951_p5, %p950_p4 }
   0xf   :  { %p953_p7 = pnand %p952_p6, %p946_p3 }
  0x11   :  { %956 = shalt.err (!%p953_p7)
}
  0x12   :  { %s1032_s28 = smov 32   ;;  %s1033_s29 = smov 2  }
  0x13   :  { %26 = dma.hbm_to_vmem [thread:$0]  %s1298_s0, 256, %s21_s19, [#allocation4], %s1032_s28, %s1032_s28, %s1033_s29  }
  0x14   :  { %s1034_s7 = smov [#allocation6]   ;;  %s957_s11 = scalar_lea.hbm %s1300_s2, 256 }
  0x15   :  { %s34_s8 = sshll.u32 %s1034_s7, 4  ;;  %p958_p8 = scmp.ne.s32.totalorder %s1300_s2, %s957_s11  ;;  %s35_s8 = int_to_ptr.vmem [resolvable:$true] %s34_s8 }
  0x16   :  { %p961_p9 = scmp.lt.u32.totalorder %s957_s11, %s1300_s2 }
  0x18   :  { %p963_p10 = pnand %p961_p9, %p958_p8 }
  0x1a   :  { %966 = shalt.err (!%p963_p10)
}
  0x1b   :  { %s967_s16 = scalar_lea.vmem %s35_s8, 256  ;;  %p972_p12 = scmp.lt.s32.totalorder %s35_s8, %s35_s8 }
  0x1c   :  { %p968_p11 = scmp.ne.s32.totalorder %s35_s8, %s967_s16  ;;  %p973_p13 = scmp.lt.s32.totalorder %s967_s16, %s967_s16 }
  0x1e   :  { %p974_p0 = por %p973_p13, %p972_p12 }
  0x20   :  { %p975_p1 = pnand %p974_p0, %p968_p11 }
  0x22   :  { %978 = shalt.err (!%p975_p1)
}
  0x23   :  { %s1035_s0 = smov 64   ;;  %s1036_s17 = smov 4  }
  0x24   :  { %40 = dma.hbm_to_vmem [thread:$0]  %s1300_s2, 256, %s35_s8, [#allocation7], %s1035_s0, %s1035_s0, %s1036_s17  }
  0x25   :  { %1023 = dma.done.wait [#allocation4], 256  }
  0x26   :  { %1024 = vsyncadd [#allocation4], 4294967040 }
  0x27   :  { %1025 = dma.done.wait [#allocation7], 256  }
  0x28   :  { %1026 = vsyncadd [#allocation7], 4294967040  ;;  %v1037_v0 = vmov 0.0   ;;  %vm1038_vm0 = vmmov 0   ;;  %v1107_v1 = vld [vmem:[#allocation6] sm:$0xff]   ;;  %vm55_vm1 = vcmask 254976  }
  0x29   :  { %810 = vmatprep.subr.bf16.mxu0 %v1037_v0  ;;  %814 = vmatprep.mubr.msk.bf16.mxu0 %vm1038_vm0, %v1037_v0  ;;  %v1110_v2 = vld [vmem:[#allocation6 + $0x8] sm:$0xff]   ;;  %vm83_vm2 = vcmask 261120   ;;  %v69_v12 = vld [vmem:[#allocation3] sm:$0x3]  ;;  %v164_v36 = vld [vmem:[#allocation3 + $0x2] sm:$0x3] }
  0x2a   :  { %818 = vmatprep.subr.bf16.mxu1 %v1037_v0  ;;  %822 = vmatprep.mubr.msk.bf16.mxu1 %vm1038_vm0, %v1037_v0  ;;  %v54_v3 = vld [vmem:[%s1299_s1] sm:$0x3]  ;;  %v245_v59 = vld [vmem:[#allocation3 + $0x4] sm:$0x3]  ;;  %s1040_s22 = smov [#allocation8]   ;;  %s1041_s24 = smov [#allocation9]  }
  0x2b   :  { %811 = vmatpush3.bf16.msra.mxu0 %v1107_v1  ;;  %819 = vmatpush3.bf16.msra.mxu1 %v1107_v1  ;;  %56 = vst.msk [vmem:[#allocation2] sm:$0x3] %vm55_vm1, %v54_v3  ;;  %v1133_v6 = vld [vmem:[%s1301_s3] ss:$0 sm:$0xff]  ;;  %s1039_s3 = smov 96   ;;  %s740_s23 = sshll.u32 %s1040_s22, 4  ;;  %s741_s23 = int_to_ptr.vmem [resolvable:$true] %s740_s23 }
  0x2c   :  { %812 = vmatprep.subr.bf16.mxu0 %v1037_v0  ;;  %820 = vmatprep.subr.bf16.mxu1 %v1037_v0  ;;  %s753_s25 = sshll.u32 %s1041_s24, 4  ;;  %s979_s26 = scalar_lea.vmem %s741_s23, 256  ;;  %s1261_s25 = int_to_ptr.vmem [resolvable:$true] %s753_s25 }
  0x2d   :  { %p980_p2 = scmp.ne.s32.totalorder %s741_s23, %s979_s26  ;;  %p984_p3 = scmp.lt.s32.totalorder %s741_s23, %s741_s23 }
  0x2e   :  { %p985_p4 = scmp.lt.s32.totalorder %s979_s26, %s979_s26 }
  0x2f   :  { %813 = vmatpush3.bf16.msra.mxu0 %v1110_v2  ;;  %821 = vmatpush3.bf16.msra.mxu1 %v1110_v2 }
  0x30   :  { %826 = vmatprep.subr.bf16.mxu0 %v1037_v0  ;;  %834 = vmatprep.subr.bf16.mxu1 %v1037_v0  ;;  %p986_p5 = por %p985_p4, %p984_p3 }
  0x32   :  { %v57_v4 = vld [vmem:[#allocation2] sm:$0x3]  ;;  %p987_p6 = pnand %p986_p5, %p980_p2 }
  0x33   :  { %v70_v5 = vpack.c.bf16 %v57_v4, %v57_v4 }
  0x35   :  { %815 = vmatmul.mubr.msk.bf16.vlgmr.msra.gmra.mrb[0].mxu0 %vm83_vm2, %v70_v5 }
  0x36   :  { %827 = vmatpush3.bf16.msra.mxu0 %v1107_v1  ;;  %830 = vmatprep.mubr.msk.bf16.mxu0 %vm1038_vm0, %v1037_v0 }
  0x37   :  { %828 = vmatprep.subr.bf16.mxu0 %v1037_v0 }
  0x3a   :  { %829 = vmatpush3.bf16.msra.mxu0 %v1110_v2 }
  0x3b   :  { %842 = vmatprep.subr.bf16.mxu0 %v1037_v0 }
 0x108   :  { %v121_v7 = vpop.f32.mrb[0].mxu0 }
 0x109   :  { %v122_v8 = vadd.f32 %v1133_v6, %v121_v7  ;;  %v816_v9 = vpop.f32.mrb[1].mxu0 }
 0x10a   :  { %v124_v10 = vpop.f32.mrb[2].mxu0 }
 0x10b   :  { %135 = vrot.lane.b32.xlu0 %v122_v8, %s1035_s0  ;;  %v817_v11 = vpop.f32.mrb[3].mxu0  ;;  %v127_v13 = vadd.f32 %v122_v8, %v69_v12 }
 0x10d   :  { %v771_v14 = vmul.f32 -1.442695, %v127_v13 }
 0x10f   :  { %887 = vpow2.f32 %v771_v14 }
 0x119   :  { %v888_v15 = vpop.eup %887 }
 0x11a   :  { %v131_v16 = vadd.f32 1.0, %v888_v15 }
 0x11c   :  { %889 = vrcp.f32 %v131_v16 }
 0x126   :  { %v890_v17 = vpop.eup %889 }
 0x127   :  { %v150_v24 = vsub.f32 1.0, %v890_v17 }
 0x17d   :  { %v136_v18 = vpop.permute.xlu0 %135 }
 0x17e   :  { %v138_v19 = vmul.f32 %v890_v17, %v136_v18 }
 0x180   :  { %140 = vrot.lane.b32.xlu0 %v138_v19, %s1035_s0 }
 0x1f2   :  { %v141_v20 = vpop.permute.xlu0 %140 }
 0x1f3   :  { %v143_v21 = vadd.f32 %v141_v20, %v69_v12 }
 0x1f5   :  { %891 = vtanh.f32 %v143_v21 }
 0x1ff   :  { %v892_v22 = vpop.eup %891 }
 0x200   :  { %146 = vrot.lane.b32.xlu1 %v892_v22, %s1039_s3  ;;  %v326_v22 = vld [vmem:[#allocation3 + $0x6] sm:$0x3] }
 0x204   :  { %152 = vrot.lane.b32.xlu1 %v57_v4, %s1032_s28 }
 0x272   :  { %v147_v23 = vpop.permute.xlu1 %146 }
 0x273   :  { %v149_v26 = vmul.f32 %v890_v17, %v147_v23 }
 0x276   :  { %v153_v25 = vpop.permute.xlu1 %152 }
 0x277   :  { %v155_v27 = vmul.f32 %v153_v25, %v150_v24 }
 0x279   :  { %v1140_v28 = vadd.f32 %v155_v27, %v149_v26 }
 0x27b   :  { %v165_v29 = vpack.c.bf16 %v1140_v28, %v1140_v28 }
 0x27d   :  { %167 = vrot.lane.b32.xlu0 %v165_v29, %s1039_s3 }
 0x2ef   :  { %v168_v30 = vpop.permute.xlu0 %167 }
 0x2f0   :  { %823 = vmatmul.mubr.msk.bf16.vlgmr.msra.gmra.mrb[0].mxu1 %vm83_vm2, %v168_v30 }
 0x2f1   :  { %835 = vmatpush3.bf16.msra.mxu1 %v1107_v1  ;;  %838 = vmatprep.mubr.msk.bf16.mxu1 %vm1038_vm0, %v1037_v0 }
 0x2f2   :  { %836 = vmatprep.subr.bf16.mxu1 %v1037_v0 }
 0x2f5   :  { %837 = vmatpush3.bf16.msra.mxu1 %v1110_v2 }
 0x2f6   :  { %850 = vmatprep.subr.bf16.mxu1 %v1037_v0 }
 0x3c3   :  { %v206_v31 = vpop.f32.mrb[0].mxu1 }
 0x3c4   :  { %v207_v32 = vadd.f32 %v1133_v6, %v206_v31  ;;  %v824_v33 = vpop.f32.mrb[1].mxu1 }
 0x3c5   :  { %v209_v34 = vpop.f32.mrb[2].mxu1 }
 0x3c6   :  { %220 = vrot.lane.b32.xlu1 %v207_v32, %s1035_s0  ;;  %v825_v35 = vpop.f32.mrb[3].mxu1  ;;  %v212_v37 = vadd.f32 %v207_v32, %v164_v36 }
 0x3c8   :  { %v773_v38 = vmul.f32 -1.442695, %v212_v37 }
 0x3ca   :  { %893 = vpow2.f32 %v773_v38 }
 0x3d4   :  { %v894_v39 = vpop.eup %893 }
 0x3d5   :  { %v216_v40 = vadd.f32 1.0, %v894_v39 }
 0x3d7   :  { %895 = vrcp.f32 %v216_v40 }
 0x3e1   :  { %v896_v41 = vpop.eup %895 }
 0x3e2   :  { %v235_v47 = vsub.f32 1.0, %v896_v41 }
 0x3e4   :  { %v236_v49 = vmul.f32 %v235_v47, %v1140_v28 }
 0x438   :  { %v221_v42 = vpop.permute.xlu1 %220 }
 0x439   :  { %v223_v43 = vmul.f32 %v896_v41, %v221_v42 }
 0x43b   :  { %225 = vrot.lane.b32.xlu0 %v223_v43, %s1035_s0 }
 0x4ad   :  { %v226_v44 = vpop.permute.xlu0 %225 }
 0x4ae   :  { %v228_v45 = vadd.f32 %v226_v44, %v164_v36 }
 0x4b0   :  { %897 = vtanh.f32 %v228_v45 }
 0x4ba   :  { %v898_v46 = vpop.eup %897 }
 0x4bb   :  { %231 = vrot.lane.b32.xlu1 %v898_v46, %s1039_s3  ;;  %v407_v46 = vld [vmem:[#allocation3 + $0x8] sm:$0x3] }
 0x52d   :  { %v232_v48 = vpop.permute.xlu1 %231 }
 0x52e   :  { %v234_v50 = vmul.f32 %v896_v41, %v232_v48 }
 0x530   :  { %v1157_v51 = vadd.f32 %v236_v49, %v234_v50 }
 0x532   :  { %v246_v52 = vpack.c.bf16 %v1157_v51, %v1157_v51 }
 0x534   :  { %248 = vrot.lane.b32.xlu0 %v246_v52, %s1039_s3 }
 0x5a6   :  { %v249_v53 = vpop.permute.xlu0 %248 }
 0x5a7   :  { %831 = vmatmul.mubr.msk.bf16.vlgmr.msra.gmra.mrb[4].mxu0 %vm83_vm2, %v249_v53 }
 0x5a8   :  { %843 = vmatpush3.bf16.msra.mxu0 %v1107_v1  ;;  %846 = vmatprep.mubr.msk.bf16.mxu0 %vm1038_vm0, %v1037_v0 }
 0x5a9   :  { %844 = vmatprep.subr.bf16.mxu0 %v1037_v0 }
 0x5ac   :  { %845 = vmatpush3.bf16.msra.mxu0 %v1110_v2 }
 0x5ad   :  { %858 = vmatprep.subr.bf16.mxu0 %v1037_v0 }
 0x67a   :  { %v287_v54 = vpop.f32.mrb[4].mxu0 }
 0x67b   :  { %v288_v55 = vadd.f32 %v1133_v6, %v287_v54  ;;  %v832_v56 = vpop.f32.mrb[5].mxu0 }
 0x67c   :  { %v290_v57 = vpop.f32.mrb[6].mxu0 }
 0x67d   :  { %301 = vrot.lane.b32.xlu1 %v288_v55, %s1035_s0  ;;  %v833_v58 = vpop.f32.mrb[7].mxu0  ;;  %v293_v60 = vadd.f32 %v288_v55, %v245_v59 }
 0x67f   :  { %v775_v61 = vmul.f32 -1.442695, %v293_v60 }
 0x681   :  { %899 = vpow2.f32 %v775_v61 }
 0x68b   :  { %v900_v62 = vpop.eup %899 }
 0x68c   :  { %v297_v63 = vadd.f32 1.0, %v900_v62 }
 0x68e   :  { %901 = vrcp.f32 %v297_v63 }
 0x698   :  { %v902_v3 = vpop.eup %901 }
 0x699   :  { %v316_v10 = vsub.f32 1.0, %v902_v3 }
 0x69b   :  { %v317_v12 = vmul.f32 %v316_v10, %v1157_v51  ;;  %v488_v10 = vld [vmem:[#allocation3 + $0xa] sm:$0x3] }
 0x6ef   :  { %v302_v4 = vpop.permute.xlu1 %301 }
 0x6f0   :  { %v304_v5 = vmul.f32 %v902_v3, %v302_v4 }
 0x6f2   :  { %306 = vrot.lane.b32.xlu0 %v304_v5, %s1035_s0 }
 0x764   :  { %v307_v7 = vpop.permute.xlu0 %306 }
 0x765   :  { %v309_v8 = vadd.f32 %v307_v7, %v245_v59 }
 0x767   :  { %903 = vtanh.f32 %v309_v8 }
 0x771   :  { %v904_v9 = vpop.eup %903 }
 0x772   :  { %312 = vrot.lane.b32.xlu1 %v904_v9, %s1039_s3 }
 0x7e4   :  { %v313_v11 = vpop.permute.xlu1 %312 }
 0x7e5   :  { %v315_v13 = vmul.f32 %v902_v3, %v313_v11 }
 0x7e7   :  { %v1174_v14 = vadd.f32 %v317_v12, %v315_v13 }
 0x7e9   :  { %v327_v15 = vpack.c.bf16 %v1174_v14, %v1174_v14 }
 0x7eb   :  { %329 = vrot.lane.b32.xlu0 %v327_v15, %s1039_s3 }
 0x85d   :  { %v330_v16 = vpop.permute.xlu0 %329 }
 0x85e   :  { %839 = vmatmul.mubr.msk.bf16.vlgmr.msra.gmra.mrb[4].mxu1 %vm83_vm2, %v330_v16 }
 0x85f   :  { %851 = vmatpush3.bf16.msra.mxu1 %v1107_v1  ;;  %854 = vmatprep.mubr.msk.bf16.mxu1 %vm1038_vm0, %v1037_v0 }
 0x860   :  { %852 = vmatprep.subr.bf16.mxu1 %v1037_v0 }
 0x863   :  { %853 = vmatpush3.bf16.msra.mxu1 %v1110_v2 }
 0x864   :  { %866 = vmatprep.subr.bf16.mxu1 %v1037_v0 }
 0x931   :  { %v368_v17 = vpop.f32.mrb[4].mxu1 }
 0x932   :  { %v369_v18 = vadd.f32 %v1133_v6, %v368_v17  ;;  %v840_v19 = vpop.f32.mrb[5].mxu1 }
 0x933   :  { %v371_v20 = vpop.f32.mrb[6].mxu1 }
 0x934   :  { %382 = vrot.lane.b32.xlu1 %v369_v18, %s1035_s0  ;;  %v841_v21 = vpop.f32.mrb[7].mxu1  ;;  %v374_v23 = vadd.f32 %v369_v18, %v326_v22 }
 0x936   :  { %v777_v24 = vmul.f32 -1.442695, %v374_v23 }
 0x938   :  { %905 = vpow2.f32 %v777_v24 }
 0x942   :  { %v906_v25 = vpop.eup %905 }
 0x943   :  { %v378_v26 = vadd.f32 1.0, %v906_v25 }
 0x945   :  { %907 = vrcp.f32 %v378_v26 }
 0x94f   :  { %v908_v27 = vpop.eup %907 }
 0x950   :  { %v397_v34 = vsub.f32 1.0, %v908_v27 }
 0x952   :  { %v398_v36 = vmul.f32 %v397_v34, %v1174_v14 }
 0x9a6   :  { %v383_v29 = vpop.permute.xlu1 %382 }
 0x9a7   :  { %v385_v30 = vmul.f32 %v908_v27, %v383_v29 }
 0x9a9   :  { %387 = vrot.lane.b32.xlu0 %v385_v30, %s1035_s0 }
 0xa1b   :  { %v388_v31 = vpop.permute.xlu0 %387 }
 0xa1c   :  { %v390_v32 = vadd.f32 %v388_v31, %v326_v22 }
 0xa1e   :  { %909 = vtanh.f32 %v390_v32  ;;  %v569_v32 = vld [vmem:[#allocation3 + $0xc] sm:$0x3] }
 0xa28   :  { %v910_v33 = vpop.eup %909 }
 0xa29   :  { %393 = vrot.lane.b32.xlu1 %v910_v33, %s1039_s3 }
 0xa9b   :  { %v394_v35 = vpop.permute.xlu1 %393 }
 0xa9c   :  { %v396_v37 = vmul.f32 %v908_v27, %v394_v35 }
 0xa9e   :  { %v1191_v38 = vadd.f32 %v398_v36, %v396_v37 }
 0xaa0   :  { %v408_v39 = vpack.c.bf16 %v1191_v38, %v1191_v38 }
 0xaa2   :  { %410 = vrot.lane.b32.xlu0 %v408_v39, %s1039_s3 }
 0xb14   :  { %v411_v40 = vpop.permute.xlu0 %410 }
 0xb15   :  { %847 = vmatmul.mubr.msk.bf16.vlgmr.msra.gmra.mrb[8].mxu0 %vm83_vm2, %v411_v40 }
 0xb16   :  { %859 = vmatpush3.bf16.msra.mxu0 %v1107_v1  ;;  %862 = vmatprep.mubr.msk.bf16.mxu0 %vm1038_vm0, %v1037_v0 }
 0xb17   :  { %860 = vmatprep.subr.bf16.mxu0 %v1037_v0 }
 0xb1a   :  { %861 = vmatpush3.bf16.msra.mxu0 %v1110_v2 }
 0xbe8   :  { %v449_v41 = vpop.f32.mrb[8].mxu0 }
 0xbe9   :  { %v450_v42 = vadd.f32 %v1133_v6, %v449_v41  ;;  %v848_v43 = vpop.f32.mrb[9].mxu0 }
 0xbea   :  { %v452_v44 = vpop.f32.mrb[10].mxu0 }
 0xbeb   :  { %463 = vrot.lane.b32.xlu1 %v450_v42, %s1035_s0  ;;  %v849_v45 = vpop.f32.mrb[11].mxu0  ;;  %v455_v47 = vadd.f32 %v450_v42, %v407_v46 }
 0xbed   :  { %v779_v48 = vmul.f32 -1.442695, %v455_v47 }
 0xbef   :  { %911 = vpow2.f32 %v779_v48 }
 0xbf9   :  { %v912_v49 = vpop.eup %911 }
 0xbfa   :  { %v459_v50 = vadd.f32 1.0, %v912_v49 }
 0xbfc   :  { %913 = vrcp.f32 %v459_v50 }
 0xc06   :  { %v914_v52 = vpop.eup %913 }
 0xc07   :  { %v478_v58 = vsub.f32 1.0, %v914_v52 }
 0xc09   :  { %v479_v60 = vmul.f32 %v478_v58, %v1191_v38 }
 0xc5d   :  { %v464_v53 = vpop.permute.xlu1 %463 }
 0xc5e   :  { %v466_v54 = vmul.f32 %v914_v52, %v464_v53 }
 0xc60   :  { %468 = vrot.lane.b32.xlu0 %v466_v54, %s1035_s0 }
 0xcd2   :  { %v469_v55 = vpop.permute.xlu0 %468 }
 0xcd3   :  { %v471_v56 = vadd.f32 %v469_v55, %v407_v46 }
 0xcd5   :  { %915 = vtanh.f32 %v471_v56 }
 0xcdf   :  { %v916_v57 = vpop.eup %915 }
 0xce0   :  { %474 = vrot.lane.b32.xlu1 %v916_v57, %s1039_s3  ;;  %v650_v57 = vld [vmem:[#allocation3 + $0xe] sm:$0x3] }
 0xd52   :  { %v475_v59 = vpop.permute.xlu1 %474 }
 0xd53   :  { %v477_v61 = vmul.f32 %v914_v52, %v475_v59 }
 0xd55   :  { %v1207_v62 = vadd.f32 %v479_v60, %v477_v61 }
 0xd57   :  { %v489_v63 = vpack.c.bf16 %v1207_v62, %v1207_v62 }
 0xd59   :  { %491 = vrot.lane.b32.xlu0 %v489_v63, %s1039_s3 }
 0xdcb   :  { %v492_v3 = vpop.permute.xlu0 %491 }
 0xdcc   :  { %855 = vmatmul.mubr.msk.bf16.vlgmr.msra.gmra.mrb[8].mxu1 %vm83_vm2, %v492_v3 }
 0xdcd   :  { %867 = vmatpush3.bf16.msra.mxu1 %v1107_v1  ;;  %870 = vmatprep.mubr.msk.bf16.mxu1 %vm1038_vm0, %v1037_v0 }
 0xdce   :  { %868 = vmatprep.subr.bf16.mxu1 %v1037_v0 }
 0xdd1   :  { %869 = vmatpush3.bf16.msra.mxu1 %v1110_v2 }
 0xe9f   :  { %v530_v4 = vpop.f32.mrb[8].mxu1 }
 0xea0   :  { %v531_v5 = vadd.f32 %v1133_v6, %v530_v4  ;;  %v856_v7 = vpop.f32.mrb[9].mxu1 }
 0xea1   :  { %v533_v8 = vpop.f32.mrb[10].mxu1 }
 0xea2   :  { %544 = vrot.lane.b32.xlu1 %v531_v5, %s1035_s0  ;;  %v857_v9 = vpop.f32.mrb[11].mxu1  ;;  %v536_v11 = vadd.f32 %v531_v5, %v488_v10 }
 0xea4   :  { %v781_v12 = vmul.f32 -1.442695, %v536_v11 }
 0xea6   :  { %917 = vpow2.f32 %v781_v12 }
 0xeb0   :  { %v918_v1 = vpop.eup %917 }
 0xeb1   :  { %v540_v13 = vadd.f32 1.0, %v918_v1 }
 0xeb3   :  { %919 = vrcp.f32 %v540_v13 }
 0xebd   :  { %v920_v15 = vpop.eup %919 }
 0xebe   :  { %v559_v19 = vsub.f32 1.0, %v920_v15 }
 0xec0   :  { %v560_v21 = vmul.f32 %v559_v19, %v1207_v62 }
 0xf14   :  { %v545_v16 = vpop.permute.xlu1 %544 }
 0xf15   :  { %v547_v0 = vmul.f32 %v920_v15, %v545_v16 }
 0xf17   :  { %549 = vrot.lane.b32.xlu0 %v547_v0, %s1035_s0 }
 0xf89   :  { %v550_v2 = vpop.permute.xlu0 %549 }
 0xf8a   :  { %v552_v17 = vadd.f32 %v550_v2, %v488_v10 }
 0xf8c   :  { %921 = vtanh.f32 %v552_v17 }
 0xf96   :  { %v922_v18 = vpop.eup %921 }
 0xf97   :  { %555 = vrot.lane.b32.xlu1 %v922_v18, %s1039_s3 }
0x1009   :  { %v556_v20 = vpop.permute.xlu1 %555 }
0x100a   :  { %v558_v22 = vmul.f32 %v920_v15, %v556_v20 }
0x100c   :  { %v1223_v23 = vadd.f32 %v560_v21, %v558_v22 }
0x100e   :  { %v570_v24 = vpack.c.bf16 %v1223_v23, %v1223_v23 }
0x1010   :  { %572 = vrot.lane.b32.xlu0 %v570_v24, %s1039_s3 }
0x1082   :  { %v573_v25 = vpop.permute.xlu0 %572 }
0x1083   :  { %863 = vmatmul.mubr.msk.bf16.vlgmr.msra.gmra.mrb[12].mxu0 %vm83_vm2, %v573_v25 }
0x1156   :  { %v611_v26 = vpop.f32.mrb[12].mxu0 }
0x1157   :  { %v612_v27 = vadd.f32 %v1133_v6, %v611_v26  ;;  %v864_v29 = vpop.f32.mrb[13].mxu0 }
0x1158   :  { %v614_v30 = vpop.f32.mrb[14].mxu0 }
0x1159   :  { %625 = vrot.lane.b32.xlu1 %v612_v27, %s1035_s0  ;;  %v865_v31 = vpop.f32.mrb[15].mxu0  ;;  %v617_v33 = vadd.f32 %v612_v27, %v569_v32 }
0x115b   :  { %v783_v34 = vmul.f32 -1.442695, %v617_v33 }
0x115d   :  { %923 = vpow2.f32 %v783_v34 }
0x1167   :  { %v924_v35 = vpop.eup %923 }
0x1168   :  { %v621_v36 = vadd.f32 1.0, %v924_v35 }
0x116a   :  { %925 = vrcp.f32 %v621_v36 }
0x1174   :  { %v926_v37 = vpop.eup %925 }
0x1175   :  { %v640_v44 = vsub.f32 1.0, %v926_v37 }
0x1177   :  { %v641_v46 = vmul.f32 %v640_v44, %v1223_v23 }
0x11cb   :  { %v626_v39 = vpop.permute.xlu1 %625 }
0x11cc   :  { %v628_v40 = vmul.f32 %v926_v37, %v626_v39 }
0x11ce   :  { %630 = vrot.lane.b32.xlu0 %v628_v40, %s1035_s0 }
0x1240   :  { %v631_v41 = vpop.permute.xlu0 %630 }
0x1241   :  { %v633_v42 = vadd.f32 %v631_v41, %v569_v32 }
0x1243   :  { %927 = vtanh.f32 %v633_v42 }
0x124d   :  { %v928_v43 = vpop.eup %927 }
0x124e   :  { %636 = vrot.lane.b32.xlu1 %v928_v43, %s1039_s3 }
0x12c0   :  { %v637_v45 = vpop.permute.xlu1 %636 }
0x12c1   :  { %v639_v47 = vmul.f32 %v926_v37, %v637_v45 }
0x12c3   :  { %v642_v48 = vadd.f32 %v641_v46, %v639_v47 }
0x12c5   :  { %v651_v49 = vpack.c.bf16 %v642_v48, %v642_v48 }
0x12c7   :  { %653 = vrot.lane.b32.xlu0 %v651_v49, %s1039_s3 }
0x1339   :  { %v654_v50 = vpop.permute.xlu0 %653 }
0x133a   :  { %871 = vmatmul.mubr.msk.bf16.vlgmr.msra.gmra.mrb[12].mxu1 %vm83_vm2, %v654_v50 }
0x140d   :  { %v692_v52 = vpop.f32.mrb[12].mxu1 }
0x140e   :  { %v693_v53 = vadd.f32 %v1133_v6, %v692_v52  ;;  %v872_v54 = vpop.f32.mrb[13].mxu1 }
0x140f   :  { %v695_v55 = vpop.f32.mrb[14].mxu1 }
0x1410   :  { %706 = vrot.lane.b32.xlu1 %v693_v53, %s1035_s0  ;;  %v873_v56 = vpop.f32.mrb[15].mxu1  ;;  %v698_v58 = vadd.f32 %v693_v53, %v650_v57 }
0x1412   :  { %v785_v59 = vmul.f32 -1.442695, %v698_v58 }
0x1414   :  { %929 = vpow2.f32 %v785_v59 }
0x141e   :  { %v930_v60 = vpop.eup %929 }
0x141f   :  { %v702_v61 = vadd.f32 1.0, %v930_v60 }
0x1421   :  { %931 = vrcp.f32 %v702_v61 }
0x142b   :  { %v932_v63 = vpop.eup %931 }
0x1482   :  { %v707_v3 = vpop.permute.xlu1 %706 }
0x1483   :  { %v709_v4 = vmul.f32 %v932_v63, %v707_v3 }
0x1485   :  { %711 = vrot.lane.b32.xlu0 %v709_v4, %s1035_s0 }
0x1489   :  { %158 = vrot.lane.b32.xlu0 %v1140_v28, %s1039_s3 }
0x148d   :  { %320 = vrot.lane.b32.xlu0 %v1174_v14, %s1039_s3  ;;  %v721_v14 = vsub.f32 1.0, %v932_v63 }
0x148f   :  { %v722_v11 = vmul.f32 %v721_v14, %v642_v48 }
0x1491   :  { %482 = vrot.lane.b32.xlu0 %v1207_v62, %s1039_s3 }
0x1495   :  { %644 = vrot.lane.b32.xlu0 %v642_v48, %s1039_s3 }
0x14f7   :  { %v712_v6 = vpop.permute.xlu0 %711 }
0x14f8   :  { %v714_v5 = vadd.f32 %v712_v6, %v650_v57 }
0x14fa   :  { %933 = vtanh.f32 %v714_v5 }
0x14fb   :  { %v159_v7 = vpop.permute.xlu0 %158 }
0x14fc   :  { %162 = vst.msk [vmem:[#allocation8] sm:$0x3] %vm55_vm1, %v159_v7 }
0x14ff   :  { %v321_v8 = vpop.permute.xlu0 %320 }
0x1500   :  { %324 = vst.msk [vmem:[#allocation8 + $0x4] sm:$0x3] %vm55_vm1, %v321_v8 }
0x1503   :  { %v483_v9 = vpop.permute.xlu0 %482 }
0x1504   :  { %v934_v10 = vpop.eup %933  ;;  %486 = vst.msk [vmem:[#allocation8 + $0x8] sm:$0x3] %vm55_vm1, %v483_v9 }
0x1505   :  { %717 = vrot.lane.b32.xlu1 %v934_v10, %s1039_s3 }
0x1507   :  { %v645_v28 = vpop.permute.xlu0 %644 }
0x1508   :  { %648 = vst.msk [vmem:[#allocation8 + $0xc] sm:$0x3] %vm55_vm1, %v645_v28 }
0x1509   :  { %239 = vrot.lane.b32.xlu1 %v1157_v51, %s1039_s3 }
0x150d   :  { %401 = vrot.lane.b32.xlu1 %v1191_v38, %s1039_s3 }
0x1511   :  { %563 = vrot.lane.b32.xlu1 %v1223_v23, %s1039_s3 }
0x1577   :  { %v718_v62 = vpop.permute.xlu1 %717 }
0x1578   :  { %v720_v12 = vmul.f32 %v932_v63, %v718_v62 }
0x157a   :  { %v723_v1 = vadd.f32 %v722_v11, %v720_v12 }
0x157b   :  { %v240_v13 = vpop.permute.xlu1 %239 }
0x157c   :  { %243 = vst.msk [vmem:[#allocation8 + $0x2] sm:$0x3] %vm55_vm1, %v240_v13  ;;  %725 = vrot.lane.b32.xlu1 %v723_v1, %s1039_s3 }
0x157f   :  { %v402_v15 = vpop.permute.xlu1 %401 }
0x1580   :  { %405 = vst.msk [vmem:[#allocation8 + $0x6] sm:$0x3] %vm55_vm1, %v402_v15 }
0x1583   :  { %v564_v51 = vpop.permute.xlu1 %563 }
0x1584   :  { %567 = vst.msk [vmem:[#allocation8 + $0xa] sm:$0x3] %vm55_vm1, %v564_v51 }
0x15ee   :  { %v726_v38 = vpop.permute.xlu1 %725 }
0x15ef   :  { %729 = vst.msk [vmem:[#allocation8 + $0xe] sm:$0x3] %vm55_vm1, %v726_v38  ;;  %730 = vst.msk [vmem:[#allocation2] sm:$0x3] %vm55_vm1, %v726_v38 }
0x15f0   :  { %734 = vst.msk [vmem:[#allocation9] sm:$0x3] %vm55_vm1, %v726_v38 }
0x15f1   :  { %990 = shalt.err (!%p987_p6)
}
0x15f2   :  { %s991_s6 = scalar_lea.hbm %s1302_s4, 256 }
0x15f3   :  { %p992_p7 = scmp.ne.s32.totalorder %s1302_s4, %s991_s6  ;;  %p995_p8 = scmp.lt.u32.totalorder %s991_s6, %s1302_s4 }
0x15f5   :  { %p997_p9 = pnand %p995_p8, %p992_p7 }
0x15f7   :  { %1000 = shalt.err (!%p997_p9)
}
0x15f8   :  { %746 = dma.vmem_to_hbm [thread:$0]  %s741_s23, 256, %s1302_s4, [#allocation5], %s1032_s28, %s1032_s28, %s1033_s29  }
0x15f9   :  { %s1001_s13 = scalar_lea.vmem %s1261_s25, 32  ;;  %p1006_p11 = scmp.lt.s32.totalorder %s1261_s25, %s1261_s25 }
0x15fa   :  { %p1002_p10 = scmp.ne.s32.totalorder %s1261_s25, %s1001_s13  ;;  %p1007_p12 = scmp.lt.s32.totalorder %s1001_s13, %s1001_s13 }
0x15fc   :  { %p1008_p13 = por %p1007_p12, %p1006_p11 }
0x15fe   :  { %p1009_p0 = pnand %p1008_p13, %p1002_p10 }
0x1600   :  { %1012 = shalt.err (!%p1009_p0)
}
0x1601   :  { %s1013_s16 = scalar_lea.hbm %s1303_s5, 32 }
0x1602   :  { %p1014_p1 = scmp.ne.s32.totalorder %s1303_s5, %s1013_s16  ;;  %p1017_p2 = scmp.lt.u32.totalorder %s1013_s16, %s1303_s5 }
0x1604   :  { %p1019_p3 = pnand %p1017_p2, %p1014_p1 }
0x1606   :  { %1022 = shalt.err (!%p1019_p3)
}
0x1607   :  { %756 = dma.vmem_to_hbm [thread:$0]  %s1261_s25, 32, %s1303_s5, [#allocation10]  }
0x1608   :  { %1027 = dma.done.wait [#allocation5], 256  }
0x1609   :  { %1028 = vsyncadd [#allocation5], 4294967040 }
0x160a   :  { %1029 = dma.done.wait [#allocation10], 32  }
0x160b   :  { %1030 = vsyncadd [#allocation10], 4294967264 }
0x160c   :  { %763 = vsyncpa [#allocation4], 1 }
0x160d   :  { %764 = vsyncpa [#allocation7], 1 }
0x160e   :  { %765 = vsyncpa [#allocation5], 1 }
0x160f   :  { %766 = vsyncpa [#allocation10], 1 }

</bundles_post_ra>
